<compile_context>
chip_gen: v6e
topology: v6e:2x2x1
jax: 0.10.0
libtpu: 0.0.40
codegen_flags: <defaults>
</compile_context>

<pallas_src>
import jax
import jax.numpy as jnp
from jax.experimental import pallas as pl
from jax.experimental.pallas import tpu as pltpu

IN_FEATURES = 784
HIDDEN = 128
OUT_FEATURES = 10
OUT_PAD = 128            # lane-dense output block
DEFAULT_TB = 1024        # batch tile (multiple of 8); ~8 MiB VMEM incl. double buffers
MIN_ROWS_FOR_SPLIT = 512 # only split a single-tile grid in two if each half is >= 256 rows


def _round_up(x, m):
    return ((x + m - 1) // m) * m


def mlp_kernel(x_ref, w1_ref, b1_ref, w2_ref, b2_ref, o_ref):
    # x_ref:  (TB, 784)    w1_ref: (784, 128)   b1_ref: (1, 128)
    # w2_ref: (128, 128)   b2_ref: (1, 128)     o_ref:  (TB, 128)
    h = jnp.dot(x_ref[...], w1_ref[...], preferred_element_type=jnp.float32)
    h = jnp.maximum(h + b1_ref[...], 0.0)               # bias + ReLU on the VPU
    h = h.astype(w2_ref.dtype)                           # no-op in the f32 path
    y = jnp.dot(h, w2_ref[...], preferred_element_type=jnp.float32) + b2_ref[...]
    o_ref[...] = y.astype(o_ref.dtype)


def simple_model_forward(x_nchw, w1, b1, w2, b2, tb=DEFAULT_TB,
                         use_bf16=False, return_padded=False):
    """x_nchw: (B, 1, 28, 28); w1: (784,128), b1: (1,128) or (128,),
    w2: (128,10), b2: (1,10) or (10,).  Returns (B, 10) f32 (or the lane/row-padded
    (B_pad, 128) block if return_padded=True)."""
    B = x_nchw.shape[0]
    x_flat = x_nchw.reshape(B, -1)                        # torch.flatten(x, 1)
    assert x_flat.shape[1] == IN_FEATURES

    in_dtype = jnp.bfloat16 if use_bf16 else jnp.float32
    x_flat = x_flat.astype(in_dtype)

    # Pad batch only to the f32/bf16 sublane multiple of 8 (<= 7 wasted rows).
    B_pad = _round_up(B, 8)
    if B_pad != B:
        x_flat = jnp.pad(x_flat, ((0, B_pad - B), (0, 0)))

    # Batch tile: no larger than the batch itself; keep it a multiple of 8.
    TB = min(tb, B_pad)
    # v7x megacore: if everything fits one tile but the batch is big, split in two.
    if TB == B_pad and B_pad >= MIN_ROWS_FOR_SPLIT:
        TB = _round_up(B_pad // 2, 8)
    n_tiles = pl.cdiv(B_pad, TB)                          # ragged last tile is masked

    # Small weight-side padding only (64 KiB): lane-dense output block.
    w1_p = w1.astype(in_dtype)
    b1_p = b1.reshape(1, HIDDEN).astype(jnp.float32)
    w2_p = jnp.pad(w2, ((0, 0), (0, OUT_PAD - OUT_FEATURES))).astype(in_dtype)
    b2_p = jnp.pad(b2.reshape(1, OUT_FEATURES),
                   ((0, 0), (0, OUT_PAD - OUT_FEATURES))).astype(jnp.float32)

    bpe = 2 if use_bf16 else 4
    flops = 2 * B_pad * (IN_FEATURES * HIDDEN + HIDDEN * OUT_PAD)
    bytes_accessed = (
        B_pad * IN_FEATURES * bpe                          # x tiles
        + IN_FEATURES * HIDDEN * bpe + HIDDEN * 4          # w1, b1 (resident)
        + HIDDEN * OUT_PAD * bpe + OUT_PAD * 4             # w2, b2 (resident)
        + B_pad * OUT_PAD * 4                              # output
    )

    out_padded = pl.pallas_call(
        mlp_kernel,
        out_shape=jax.ShapeDtypeStruct((B_pad, OUT_PAD), jnp.float32),
        grid=(n_tiles,),
        in_specs=[
            # x tile advances with the batch grid axis; full 784 last dim (no K pad).
            pl.BlockSpec((TB, IN_FEATURES), lambda i: (i, 0)),
            # Weights / biases: constant index_map -> fetched once, resident in VMEM.
            pl.BlockSpec((IN_FEATURES, HIDDEN), lambda i: (0, 0)),
            pl.BlockSpec((1, HIDDEN), lambda i: (0, 0)),
            pl.BlockSpec((HIDDEN, OUT_PAD), lambda i: (0, 0)),
            pl.BlockSpec((1, OUT_PAD), lambda i: (0, 0)),
        ],
        out_specs=pl.BlockSpec((TB, OUT_PAD), lambda i: (i, 0)),
        compiler_params=pltpu.CompilerParams(
            dimension_semantics=("parallel",),             # shard batch tiles across TCs
        ),
        cost_estimate=pl.CostEstimate(
            flops=flops, transcendentals=0, bytes_accessed=bytes_accessed
        ),
    )(x_flat, w1_p, b1_p, w2_p, b2_p)

    if return_padded:
        return out_padded                                  # (B_pad, 128): consumer fuses slice
    return out_padded[:B, :OUT_FEATURES]


def init_params(key):
    """Deterministic init mimicking nn.Linear's uniform(-1/sqrt(fan_in), +) init.
    Weights stored as (in_features, out_features), i.e. transposed vs PyTorch."""
    k1, k2, k3, k4 = jax.random.split(key, 4)
    bound1 = 1.0 / jnp.sqrt(IN_FEATURES)
    bound2 = 1.0 / jnp.sqrt(HIDDEN)
    w1 = jax.random.uniform(k1, (IN_FEATURES, HIDDEN), jnp.float32, -bound1, bound1)
    b1 = jax.random.uniform(k2, (1, HIDDEN), jnp.float32, -bound1, bound1)
    w2 = jax.random.uniform(k3, (HIDDEN, OUT_FEATURES), jnp.float32, -bound2, bound2)
    b2 = jax.random.uniform(k4, (1, OUT_FEATURES), jnp.float32, -bound2, bound2)
    return w1, b1, w2, b2


if __name__ == "__main__":
    key = jax.random.PRNGKey(0)
    k_x, k_p = jax.random.split(key)

    B = 2
    x = jax.random.normal(k_x, (B, 1, 28, 28), jnp.float32)   # NCHW, flattens to 784
    w1, b1, w2, b2 = init_params(k_p)

    out = simple_model_forward(x, w1, b1, w2, b2)
    out = jax.block_until_ready(out)

    # Pure-JAX reference of the same math.
    x_flat = x.reshape(B, -1)
    ref = jnp.maximum(x_flat @ w1 + b1, 0.0) @ w2 + b2
    assert out.shape == (B, 10)
    assert jnp.allclose(out, ref, atol=1e-4, rtol=1e-4)

    print("KERNEL_OK")
</pallas_src>

<mosaic_0001>
module attributes {stable_mosaic.version = 11 : i64} {
  func.func @mlp_kernel(%arg0: i32, %arg1: memref<8x784xf32, #tpu.memory_space<vmem>>, %arg2: memref<784x128xf32, #tpu.memory_space<vmem>>, %arg3: memref<1x128xf32, #tpu.memory_space<vmem>>, %arg4: memref<128x128xf32, #tpu.memory_space<vmem>>, %arg5: memref<1x128xf32, #tpu.memory_space<vmem>>, %arg6: memref<8x128xf32, #tpu.memory_space<vmem>>) attributes {dimension_semantics = [#tpu.dimension_semantics<parallel>], iteration_bounds = array<i64: 1>, scalar_prefetch = 0 : i64, scratch_operands = 0 : i64, tpu.core_type = #tpu.core_type<tc>, window_params = [{transform_indices = @transform_0, window_bounds = array<i64: 8, 784>}, {pipeline_mode = #tpu.pipeline_mode<synchronous>, transform_indices = @transform_1, window_bounds = array<i64: 784, 128>}, {pipeline_mode = #tpu.pipeline_mode<synchronous>, transform_indices = @transform_2, window_bounds = array<i64: 1, 128>}, {pipeline_mode = #tpu.pipeline_mode<synchronous>, transform_indices = @transform_3, window_bounds = array<i64: 128, 128>}, {pipeline_mode = #tpu.pipeline_mode<synchronous>, transform_indices = @transform_4, window_bounds = array<i64: 1, 128>}, {transform_indices = @transform_5, window_bounds = array<i64: 8, 128>}]} {
    %c0 = arith.constant 0 : index
    %c0_0 = arith.constant 0 : index
    %0 = vector.load %arg1[%c0, %c0_0] : memref<8x784xf32, #tpu.memory_space<vmem>>, vector<8x784xf32>
    %c0_1 = arith.constant 0 : index
    %c0_2 = arith.constant 0 : index
    %1 = vector.load %arg2[%c0_1, %c0_2] : memref<784x128xf32, #tpu.memory_space<vmem>>, vector<784x128xf32>
    %cst = arith.constant dense<0.000000e+00> : vector<8x128xf32>
    %2 = tpu.matmul %0, %1, %cst {dimension_numbers = #tpu.dot_dimension_numbers<[1], [0], [0], [1], [0, 0, 1, 1], [], []>} : vector<8x784xf32>, vector<784x128xf32>, vector<8x128xf32> -> vector<8x128xf32>
    %c0_3 = arith.constant 0 : index
    %c0_4 = arith.constant 0 : index
    %3 = vector.load %arg3[%c0_3, %c0_4] : memref<1x128xf32, #tpu.memory_space<vmem>>, vector<1x128xf32>
    %4 = vector.broadcast %3 : vector<1x128xf32> to vector<8x128xf32>
    %5 = arith.addf %2, %4 : vector<8x128xf32>
    %cst_5 = arith.constant 0.000000e+00 : f32
    %6 = vector.broadcast %cst_5 : f32 to vector<8x128xf32>
    %7 = arith.maximumf %5, %6 : vector<8x128xf32>
    %c0_6 = arith.constant 0 : index
    %c0_7 = arith.constant 0 : index
    %8 = vector.load %arg4[%c0_6, %c0_7] : memref<128x128xf32, #tpu.memory_space<vmem>>, vector<128x128xf32>
    %cst_8 = arith.constant dense<0.000000e+00> : vector<8x128xf32>
    %9 = tpu.matmul %7, %8, %cst_8 {dimension_numbers = #tpu.dot_dimension_numbers<[1], [0], [0], [1], [0, 0, 1, 1], [], []>} : vector<8x128xf32>, vector<128x128xf32>, vector<8x128xf32> -> vector<8x128xf32>
    %c0_9 = arith.constant 0 : index
    %c0_10 = arith.constant 0 : index
    %10 = vector.load %arg5[%c0_9, %c0_10] : memref<1x128xf32, #tpu.memory_space<vmem>>, vector<1x128xf32>
    %11 = vector.broadcast %10 : vector<1x128xf32> to vector<8x128xf32>
    %12 = arith.addf %9, %11 : vector<8x128xf32>
    %c0_11 = arith.constant 0 : index
    %c0_12 = arith.constant 0 : index
    %13 = vector.load %arg6[%c0_11, %c0_12] : memref<8x128xf32, #tpu.memory_space<vmem>>, vector<8x128xf32>
    tpu.vector_store %arg6[%c0_11, %c0_12], %12 {strides = array<i32>} : memref<8x128xf32, #tpu.memory_space<vmem>>, vector<8x128xf32>,
    return
  }
  func.func @transform_0(%arg0: i32) -> (i32, i32) {
    %c0_i32 = arith.constant 0 : i32
    %c0_i32_0 = arith.constant 0 : i32
    return %arg0, %c0_i32 : i32, i32
  }
  func.func @transform_1(%arg0: i32) -> (i32, i32) {
    %c0_i32 = arith.constant 0 : i32
    %c0_i32_0 = arith.constant 0 : i32
    %c0_i32_1 = arith.constant 0 : i32
    return %c0_i32, %c0_i32_0 : i32, i32
  }
  func.func @transform_2(%arg0: i32) -> (i32, i32) {
    %c0_i32 = arith.constant 0 : i32
    %c0_i32_0 = arith.constant 0 : i32
    %c0_i32_1 = arith.constant 0 : i32
    return %c0_i32, %c0_i32_0 : i32, i32
  }
  func.func @transform_3(%arg0: i32) -> (i32, i32) {
    %c0_i32 = arith.constant 0 : i32
    %c0_i32_0 = arith.constant 0 : i32
    %c0_i32_1 = arith.constant 0 : i32
    return %c0_i32, %c0_i32_0 : i32, i32
  }
  func.func @transform_4(%arg0: i32) -> (i32, i32) {
    %c0_i32 = arith.constant 0 : i32
    %c0_i32_0 = arith.constant 0 : i32
    %c0_i32_1 = arith.constant 0 : i32
    return %c0_i32, %c0_i32_0 : i32, i32
  }
  func.func @transform_5(%arg0: i32) -> (i32, i32) {
    %c0_i32 = arith.constant 0 : i32
    %c0_i32_0 = arith.constant 0 : i32
    return %arg0, %c0_i32 : i32, i32
  }
}

</mosaic_0001>

<bundles_post_ra>
// kernel: tpu_custom_call.1
= control target key start
LH: loop header
LB: loop body
LE: loop exit
PB: predicated region body
PF: predicated region fallthrough
CT: control target
= control target key end

     0   :  { %10 = vsyncpa [#allocation3], 0  ;;  %s907_s0 = inlined_call_operand.hbm [shape: f32[8,784], index: 0, kind: input, shape index: {}]   ;;  %s908_s1 = inlined_call_operand.hbm [shape: f32[784,128], index: 1, kind: input, shape index: {}]   ;;  %s909_s2 = inlined_call_operand.vmem [shape: f32[1,128], index: 2, kind: input, shape index: {}]   ;;  %s910_s3 = inlined_call_operand.hbm [shape: f32[128,128], index: 3, kind: input, shape index: {}]   ;;  %s911_s4 = inlined_call_operand.vmem [shape: f32[1,128], index: 4, kind: input, shape index: {}]   ;;  %s912_s5 = inlined_call_operand.hbm [shape: f32[8,128], index: 5, kind: output, shape index: {}]  }
   0x1   :  { %11 = vsyncpa [#allocation6], 0 }
   0x2   :  { %12 = vsyncpa [#allocation4], 0  ;;  %s831_s18 = smov [#allocation5]  }
   0x3   :  { %s28_s19 = sshll.u32 %s831_s18, 4  ;;  %s29_s19 = int_to_ptr.vmem [resolvable:$true] %s28_s19 }
   0x4   :  { %s753_s20 = scalar_lea.vmem %s29_s19, 12544  ;;  %p758_p1 = scmp.lt.s32.totalorder %s29_s19, %s29_s19 }
   0x5   :  { %p754_p0 = scmp.ne.s32.totalorder %s29_s19, %s753_s20  ;;  %p759_p2 = scmp.lt.s32.totalorder %s753_s20, %s753_s20 }
   0x7   :  { %p760_p3 = por %p759_p2, %p758_p1 }
   0x9   :  { %p761_p4 = pnand %p760_p3, %p754_p0 }
   0xb   :  { %764 = shalt.err (!%p761_p4)
}
   0xc   :  { %s832_s21 = smov 128   ;;  %s833_s22 = smov 8  }
   0xd   :  { %34 = dma.hbm_to_vmem [thread:$0]  %s908_s1, 12544, %s29_s19, [#allocation6], %s832_s21, %s832_s21, %s833_s22  }
   0xe   :  { %s834_s25 = smov [#allocation2]   ;;  %s835_s27 = smov [#allocation7]  }
   0xf   :  { %s19_s26 = sshll.u32 %s834_s25, 4  ;;  %s42_s28 = sshll.u32 %s835_s27, 4  ;;  %s20_s26 = int_to_ptr.vmem [resolvable:$true] %s19_s26  ;;  %s43_s28 = int_to_ptr.vmem [resolvable:$true] %s42_s28 }
  0x10   :  { %s773_s29 = scalar_lea.vmem %s20_s26, 896  ;;  %p778_p6 = scmp.lt.s32.totalorder %s20_s26, %s20_s26 }
  0x11   :  { %p774_p5 = scmp.ne.s32.totalorder %s20_s26, %s773_s29  ;;  %p779_p7 = scmp.lt.s32.totalorder %s773_s29, %s773_s29 }
  0x13   :  { %p780_p8 = por %p779_p7, %p778_p6 }
  0x15   :  { %p781_p9 = pnand %p780_p8, %p774_p5 }
  0x17   :  { %784 = shalt.err (!%p781_p9)
}
  0x18   :  { %22 = dma.hbm_to_vmem [thread:$0]  %s907_s0, 896, %s20_s26, [#allocation3]  }
  0x19   :  { %s793_s7 = scalar_lea.vmem %s43_s28, 2048  ;;  %p798_p11 = scmp.lt.s32.totalorder %s43_s28, %s43_s28 }
  0x1a   :  { %p794_p10 = scmp.ne.s32.totalorder %s43_s28, %s793_s7  ;;  %p799_p12 = scmp.lt.s32.totalorder %s793_s7, %s793_s7 }
  0x1c   :  { %p800_p13 = por %p799_p12, %p798_p11 }
  0x1e   :  { %p801_p0 = pnand %p800_p13, %p794_p10 }
  0x20   :  { %804 = shalt.err (!%p801_p0)
}
  0x21   :  { %48 = dma.hbm_to_vmem [thread:$0]  %s910_s3, 2048, %s43_s28, [#allocation6], %s832_s21, %s832_s21, %s833_s22  }
  0x22   :  { %825 = dma.done.wait [#allocation3], 896  }
  0x23   :  { %826 = vsyncadd [#allocation3], 4294966400 }
  0x24   :  { %827 = dma.done.wait [#allocation6], 14592  }
  0x25   :  { %828 = vsyncadd [#allocation6], 4294952704  ;;  %v98_v0 = vld [vmem:[#allocation5 + $0xf8] sm:$0xff]  ;;  %v97_v2 = vld [vmem:[#allocation5 + $0xf0] sm:$0xff]  ;;  %vm172_vm0 = vcmask 130048   ;;  %vm837_vm1 = vmmov 0  }
  0x26   :  { %v82_v1 = vld [vmem:[#allocation5 + $0x78] sm:$0xff]  ;;  %570 = vmatprep.subr.mxu0 %v98_v0  ;;  %v81_v4 = vld [vmem:[#allocation5 + $0x70] sm:$0xff]  ;;  %v96_v6 = vld [vmem:[#allocation5 + $0xe8] sm:$0xff]  ;;  %s838_s11 = smov [#allocation8]  }
  0x27   :  { %v130_v3 = vld [vmem:[#allocation5 + $0x1f8] sm:$0xff]  ;;  %571 = vmatpush3.msra.mxu0 %v82_v1  ;;  %v129_v7 = vld [vmem:[#allocation5 + $0x1f0] sm:$0xff]  ;;  %v80_v8 = vld [vmem:[#allocation5 + $0x68] sm:$0xff]  ;;  %s557_s12 = sshll.u32 %s838_s11, 4  ;;  %s558_s12 = int_to_ptr.vmem [resolvable:$true] %s557_s12 }
  0x28   :  { %v114_v5 = vld [vmem:[#allocation5 + $0x178] sm:$0xff]  ;;  %605 = vmatprep.subr.mxu1 %v130_v3  ;;  %572 = vmatprep.subr.mxu0 %v97_v2  ;;  %v113_v9 = vld [vmem:[#allocation5 + $0x170] sm:$0xff]  ;;  %v128_v10 = vld [vmem:[#allocation5 + $0x1e8] sm:$0xff]  ;;  %p810_p2 = scmp.lt.s32.totalorder %s558_s12, %s558_s12 }
  0x29   :  { %606 = vmatpush3.msra.mxu1 %v114_v5  ;;  %573 = vmatpush3.msra.mxu0 %v81_v4  ;;  %v95_v11 = vld [vmem:[#allocation5 + $0xe0] sm:$0xff]  ;;  %v112_v12 = vld [vmem:[#allocation5 + $0x168] sm:$0xff]  ;;  %v94_v15 = vld [vmem:[#allocation5 + $0xd8] sm:$0xff] }
  0x2a   :  { %607 = vmatprep.subr.mxu1 %v129_v7  ;;  %574 = vmatprep.subr.mxu0 %v96_v6  ;;  %v79_v13 = vld [vmem:[#allocation5 + $0x60] sm:$0xff]  ;;  %v78_v17 = vld [vmem:[#allocation5 + $0x58] sm:$0xff]  ;;  %v93_v19 = vld [vmem:[#allocation5 + $0xd0] sm:$0xff] }
  0x2b   :  { %608 = vmatpush3.msra.mxu1 %v113_v9  ;;  %v127_v14 = vld [vmem:[#allocation5 + $0x1e0] sm:$0xff]  ;;  %575 = vmatpush3.msra.mxu0 %v80_v8  ;;  %v126_v18 = vld [vmem:[#allocation5 + $0x1d8] sm:$0xff]  ;;  %v77_v21 = vld [vmem:[#allocation5 + $0x50] sm:$0xff] }
  0x2c   :  { %609 = vmatprep.subr.mxu1 %v128_v10  ;;  %v111_v16 = vld [vmem:[#allocation5 + $0x160] sm:$0xff]  ;;  %576 = vmatprep.subr.mxu0 %v95_v11  ;;  %v110_v20 = vld [vmem:[#allocation5 + $0x158] sm:$0xff]  ;;  %v125_v22 = vld [vmem:[#allocation5 + $0x1d0] sm:$0xff] }
  0x2d   :  { %610 = vmatpush3.msra.mxu1 %v112_v12  ;;  %577 = vmatpush3.msra.mxu0 %v79_v13  ;;  %v92_v23 = vld [vmem:[#allocation5 + $0xc8] sm:$0xff]  ;;  %v109_v24 = vld [vmem:[#allocation5 + $0x150] sm:$0xff]  ;;  %v91_v27 = vld [vmem:[#allocation5 + $0xc0] sm:$0xff] }
  0x2e   :  { %611 = vmatprep.subr.mxu1 %v127_v14  ;;  %578 = vmatprep.subr.mxu0 %v94_v15  ;;  %v76_v25 = vld [vmem:[#allocation5 + $0x48] sm:$0xff]  ;;  %v75_v29 = vld [vmem:[#allocation5 + $0x40] sm:$0xff]  ;;  %v90_v31 = vld [vmem:[#allocation5 + $0xb8] sm:$0xff]  ;;  %v836_v14 = vmov 0.0  }
  0x2f   :  { %612 = vmatpush3.msra.mxu1 %v111_v16  ;;  %579 = vmatpush3.msra.mxu0 %v78_v17  ;;  %v124_v26 = vld [vmem:[#allocation5 + $0x1c8] sm:$0xff]  ;;  %v123_v30 = vld [vmem:[#allocation5 + $0x1c0] sm:$0xff]  ;;  %v74_v33 = vld [vmem:[#allocation5 + $0x38] sm:$0xff] }
  0x30   :  { %613 = vmatprep.subr.mxu1 %v126_v18  ;;  %580 = vmatprep.subr.mxu0 %v93_v19  ;;  %v108_v28 = vld [vmem:[#allocation5 + $0x148] sm:$0xff]  ;;  %v107_v32 = vld [vmem:[#allocation5 + $0x140] sm:$0xff]  ;;  %v122_v34 = vld [vmem:[#allocation5 + $0x1b8] sm:$0xff] }
  0x31   :  { %614 = vmatpush3.msra.mxu1 %v110_v20  ;;  %581 = vmatpush3.msra.mxu0 %v77_v21  ;;  %v89_v35 = vld [vmem:[#allocation5 + $0xb0] sm:$0xff]  ;;  %v106_v36 = vld [vmem:[#allocation5 + $0x138] sm:$0xff]  ;;  %v88_v39 = vld [vmem:[#allocation5 + $0xa8] sm:$0xff] }
  0x32   :  { %615 = vmatprep.subr.mxu1 %v125_v22  ;;  %582 = vmatprep.subr.mxu0 %v92_v23  ;;  %v73_v37 = vld [vmem:[#allocation5 + $0x30] sm:$0xff]  ;;  %v72_v41 = vld [vmem:[#allocation5 + $0x28] sm:$0xff]  ;;  %v87_v43 = vld [vmem:[#allocation5 + $0xa0] sm:$0xff] }
  0x33   :  { %616 = vmatpush3.msra.mxu1 %v109_v24  ;;  %583 = vmatpush3.msra.mxu0 %v76_v25  ;;  %v121_v38 = vld [vmem:[#allocation5 + $0x1b0] sm:$0xff]  ;;  %v120_v42 = vld [vmem:[#allocation5 + $0x1a8] sm:$0xff]  ;;  %v71_v45 = vld [vmem:[#allocation5 + $0x20] sm:$0xff] }
  0x34   :  { %617 = vmatprep.subr.mxu1 %v124_v26  ;;  %584 = vmatprep.subr.mxu0 %v91_v27  ;;  %v105_v40 = vld [vmem:[#allocation5 + $0x130] sm:$0xff]  ;;  %v104_v44 = vld [vmem:[#allocation5 + $0x128] sm:$0xff]  ;;  %v119_v46 = vld [vmem:[#allocation5 + $0x1a0] sm:$0xff] }
  0x35   :  { %618 = vmatpush3.msra.mxu1 %v108_v28  ;;  %585 = vmatpush3.msra.mxu0 %v75_v29  ;;  %v86_v47 = vld [vmem:[#allocation5 + $0x98] sm:$0xff]  ;;  %v103_v48 = vld [vmem:[#allocation5 + $0x120] sm:$0xff]  ;;  %v85_v51 = vld [vmem:[#allocation5 + $0x90] sm:$0xff] }
  0x36   :  { %619 = vmatprep.subr.mxu1 %v123_v30  ;;  %586 = vmatprep.subr.mxu0 %v90_v31  ;;  %v70_v49 = vld [vmem:[#allocation5 + $0x18] sm:$0xff]  ;;  %v69_v53 = vld [vmem:[#allocation5 + $0x10] sm:$0xff]  ;;  %v84_v55 = vld [vmem:[#allocation5 + $0x88] sm:$0xff] }
  0x37   :  { %620 = vmatpush3.msra.mxu1 %v107_v32  ;;  %587 = vmatpush3.msra.mxu0 %v74_v33  ;;  %v118_v50 = vld [vmem:[#allocation5 + $0x198] sm:$0xff]  ;;  %v117_v54 = vld [vmem:[#allocation5 + $0x190] sm:$0xff]  ;;  %v68_v57 = vld [vmem:[#allocation5 + $0x8] sm:$0xff] }
  0x38   :  { %621 = vmatprep.subr.mxu1 %v122_v34  ;;  %588 = vmatprep.subr.mxu0 %v89_v35  ;;  %v102_v52 = vld [vmem:[#allocation5 + $0x118] sm:$0xff]  ;;  %v101_v56 = vld [vmem:[#allocation5 + $0x110] sm:$0xff]  ;;  %v116_v58 = vld [vmem:[#allocation5 + $0x188] sm:$0xff] }
  0x39   :  { %622 = vmatpush3.msra.mxu1 %v106_v36  ;;  %589 = vmatpush3.msra.mxu0 %v73_v37  ;;  %v83_v59 = vld [vmem:[#allocation5 + $0x80] sm:$0xff]  ;;  %v61_v60 = vld [vmem:[#allocation2 + $0x8] sm:$0xff]  ;;  %v100_v62 = vld [vmem:[#allocation5 + $0x108] sm:$0xff] }
  0x3a   :  { %623 = vmatprep.subr.mxu1 %v121_v38  ;;  %590 = vmatprep.subr.mxu0 %v88_v39  ;;  %v67_v61 = vld [vmem:[#allocation5] sm:$0xff]  ;;  %v60_v63 = vld [vmem:[#allocation2] sm:$0xff]  ;;  %v162_v1 = vld [vmem:[#allocation5 + $0x2f8] sm:$0xff] }
  0x3b   :  { %624 = vmatpush3.msra.mxu1 %v105_v40  ;;  %591 = vmatpush3.msra.mxu0 %v72_v41  ;;  %v115_v0 = vld [vmem:[#allocation5 + $0x180] sm:$0xff]  ;;  %v146_v4 = vld [vmem:[#allocation5 + $0x278] sm:$0xff]  ;;  %v161_v6 = vld [vmem:[#allocation5 + $0x2f0] sm:$0xff] }
  0x3c   :  { %625 = vmatprep.subr.mxu1 %v120_v42  ;;  %592 = vmatprep.subr.mxu0 %v87_v43  ;;  %v99_v2 = vld [vmem:[#allocation5 + $0x100] sm:$0xff]  ;;  %v62_v5 = vld [vmem:[#allocation2 + $0x10] sm:$0xff]  ;;  %v145_v7 = vld [vmem:[#allocation5 + $0x270] sm:$0xff] }
  0x3d   :  { %626 = vmatpush3.msra.mxu1 %v104_v44  ;;  %593 = vmatpush3.msra.mxu0 %v71_v45  ;;  %v63_v3 = vld [vmem:[#allocation2 + $0x18] sm:$0xff]  ;;  %v65_v8 = vld [vmem:[#allocation2 + $0x28] sm:$0xff]  ;;  %v160_v9 = vld [vmem:[#allocation5 + $0x2e8] sm:$0xff] }
  0x3e   :  { %627 = vmatprep.subr.mxu1 %v119_v46  ;;  %594 = vmatprep.subr.mxu0 %v86_v47  ;;  %v144_v10 = vld [vmem:[#allocation5 + $0x268] sm:$0xff]  ;;  %v159_v12 = vld [vmem:[#allocation5 + $0x2e0] sm:$0xff]  ;;  %v158_v16 = vld [vmem:[#allocation5 + $0x2d8] sm:$0xff] }
  0x3f   :  { %628 = vmatpush3.msra.mxu1 %v103_v48  ;;  %595 = vmatpush3.msra.mxu0 %v70_v49  ;;  %v164_v11 = vld [vmem:[#allocation5 + $0x308] sm:$0xff]  ;;  %v143_v13 = vld [vmem:[#allocation5 + $0x260] sm:$0xff]  ;;  %v142_v17 = vld [vmem:[#allocation5 + $0x258] sm:$0xff] }
  0x40   :  { %629 = vmatprep.subr.mxu1 %v118_v50  ;;  %596 = vmatprep.subr.mxu0 %v85_v51  ;;  %v163_v15 = vld [vmem:[#allocation5 + $0x300] sm:$0xff]  ;;  %v66_v18 = vld [vmem:[#allocation2 + $0x30] sm:$0xff]  ;;  %v157_v19 = vld [vmem:[#allocation5 + $0x2d0] sm:$0xff] }
  0x41   :  { %630 = vmatpush3.msra.mxu1 %v102_v52  ;;  %597 = vmatpush3.msra.mxu0 %v69_v53  ;;  %v141_v20 = vld [vmem:[#allocation5 + $0x250] sm:$0xff]  ;;  %v156_v21 = vld [vmem:[#allocation5 + $0x2c8] sm:$0xff]  ;;  %v155_v23 = vld [vmem:[#allocation5 + $0x2c0] sm:$0xff] }
  0x42   :  { %631 = vmatprep.subr.mxu1 %v117_v54  ;;  %598 = vmatprep.subr.mxu0 %v84_v55  ;;  %v140_v22 = vld [vmem:[#allocation5 + $0x248] sm:$0xff]  ;;  %v139_v24 = vld [vmem:[#allocation5 + $0x240] sm:$0xff]  ;;  %v154_v25 = vld [vmem:[#allocation5 + $0x2b8] sm:$0xff] }
  0x43   :  { %632 = vmatpush3.msra.mxu1 %v101_v56  ;;  %599 = vmatpush3.msra.mxu0 %v68_v57  ;;  %v138_v26 = vld [vmem:[#allocation5 + $0x238] sm:$0xff]  ;;  %v153_v27 = vld [vmem:[#allocation5 + $0x2b0] sm:$0xff]  ;;  %v152_v29 = vld [vmem:[#allocation5 + $0x2a8] sm:$0xff] }
  0x44   :  { %633 = vmatprep.subr.mxu1 %v116_v58  ;;  %600 = vmatprep.subr.mxu0 %v83_v59  ;;  %v137_v28 = vld [vmem:[#allocation5 + $0x230] sm:$0xff]  ;;  %v136_v30 = vld [vmem:[#allocation5 + $0x228] sm:$0xff]  ;;  %v151_v31 = vld [vmem:[#allocation5 + $0x2a0] sm:$0xff] }
  0x45   :  { %240 = vmatprep.mubr.f32.mxu0 %v61_v60  ;;  %601 = vmatpush3.msra.mxu0 %v67_v61  ;;  %v135_v32 = vld [vmem:[#allocation5 + $0x220] sm:$0xff]  ;;  %v150_v33 = vld [vmem:[#allocation5 + $0x298] sm:$0xff]  ;;  %v149_v35 = vld [vmem:[#allocation5 + $0x290] sm:$0xff] }
  0x46   :  { %634 = vmatpush3.msra.mxu1 %v100_v62  ;;  %241 = vmatmul.mubr.f32.vlgmr.msra.gmra.mxu0 %v60_v63  ;;  %v134_v34 = vld [vmem:[#allocation5 + $0x218] sm:$0xff]  ;;  %v133_v36 = vld [vmem:[#allocation5 + $0x210] sm:$0xff]  ;;  %v148_v37 = vld [vmem:[#allocation5 + $0x288] sm:$0xff] }
  0x47   :  { %635 = vmatprep.subr.mxu1 %v115_v0  ;;  %640 = vmatprep.subr.mxu0 %v162_v1  ;;  %v132_v38 = vld [vmem:[#allocation5 + $0x208] sm:$0xff]  ;;  %v147_v39 = vld [vmem:[#allocation5 + $0x280] sm:$0xff]  ;;  %v470_v44 = vld [vmem:[#allocation7 + $0x68] sm:$0xff] }
  0x48   :  { %636 = vmatpush3.msra.mxu1 %v99_v2  ;;  %310 = vmatprep.mubr.f32.mxu1 %v63_v3  ;;  %v131_v40 = vld [vmem:[#allocation5 + $0x200] sm:$0xff]  ;;  %v64_v41 = vld [vmem:[#allocation2 + $0x20] sm:$0xff]  ;;  %v469_v45 = vld [vmem:[#allocation7 + $0x60] sm:$0xff] }
  0x49   :  { %641 = vmatpush3.msra.mxu0 %v146_v4  ;;  %311 = vmatmul.mubr.f32.vlgmr.msra.gmra.mxu1 %v62_v5  ;;  %v472_v42 = vld [vmem:[#allocation7 + $0x78] sm:$0xff]  ;;  %v471_v43 = vld [vmem:[#allocation7 + $0x70] sm:$0xff]  ;;  %v466_v48 = vld [vmem:[#allocation7 + $0x48] sm:$0xff] }
  0x4a   :  { %642 = vmatprep.subr.mxu0 %v161_v6  ;;  %380 = vmatprep.mubr.f32.mxu0 %v65_v8  ;;  %v468_v46 = vld [vmem:[#allocation7 + $0x58] sm:$0xff]  ;;  %v467_v47 = vld [vmem:[#allocation7 + $0x50] sm:$0xff]  ;;  %v465_v49 = vld [vmem:[#allocation7 + $0x40] sm:$0xff] }
  0x4b   :  { %643 = vmatpush3.msra.mxu0 %v145_v7  ;;  %695 = vmatprep.subr.mxu1 %v836_v14  ;;  %v464_v50 = vld [vmem:[#allocation7 + $0x38] sm:$0xff]  ;;  %v463_v51 = vld [vmem:[#allocation7 + $0x30] sm:$0xff]  ;;  %v462_v52 = vld [vmem:[#allocation7 + $0x28] sm:$0xff] }
  0x4c   :  { %644 = vmatprep.subr.mxu0 %v160_v9  ;;  %696 = vmatpush3.msra.mxu1 %v164_v11  ;;  %v461_v53 = vld [vmem:[#allocation7 + $0x20] sm:$0xff]  ;;  %v460_v54 = vld [vmem:[#allocation7 + $0x18] sm:$0xff]  ;;  %v459_v55 = vld [vmem:[#allocation7 + $0x10] sm:$0xff] }
  0x4d   :  { %645 = vmatpush3.msra.mxu0 %v144_v10  ;;  %697 = vmatprep.subr.mxu1 %v836_v14  ;;  %v458_v56 = vld [vmem:[#allocation7 + $0x8] sm:$0xff]  ;;  %v457_v57 = vld [vmem:[#allocation7] sm:$0xff]  ;;  %v567_v1 = vld [vmem:[%s909_s2] ss:$0 sm:$0xff]  ;;  %s805_s2 = scalar_lea.vmem %s558_s12, 128 }
  0x4e   :  { %646 = vmatprep.subr.mxu0 %v159_v12  ;;  %698 = vmatpush3.msra.mxu1 %v163_v15  ;;  %v569_v11 = vld [vmem:[%s911_s4] ss:$0 sm:$0xff]  ;;  %p806_p1 = scmp.ne.s32.totalorder %s558_s12, %s805_s2  ;;  %p811_p3 = scmp.lt.s32.totalorder %s805_s2, %s805_s2 }
  0x4f   :  { %647 = vmatpush3.msra.mxu0 %v143_v13  ;;  %699 = vmatprep.mubr.msk.f32.mxu1 %vm837_vm1, %v836_v14 }
  0x50   :  { %648 = vmatprep.subr.mxu0 %v158_v16  ;;  %700 = vmatmul.mubr.msk.f32.vlgmr.msra.gmra.mxu1 %vm172_vm0, %v66_v18  ;;  %p812_p4 = por %p811_p3, %p810_p2 }
  0x51   :  { %649 = vmatpush3.msra.mxu0 %v142_v17  ;;  %702 = vmatprep.subr.mxu1 %v836_v14 }
  0x52   :  { %650 = vmatprep.subr.mxu0 %v157_v19  ;;  %734 = vmatprep.mubr.msk.f32.mxu1 %vm837_vm1, %v836_v14  ;;  %p813_p5 = pnand %p812_p4, %p806_p1 }
  0x53   :  { %651 = vmatpush3.msra.mxu0 %v141_v20  ;;  %703 = vmatpush3.msra.mxu1 %v472_v42 }
  0x54   :  { %652 = vmatprep.subr.mxu0 %v156_v21  ;;  %704 = vmatprep.subr.mxu1 %v836_v14 }
  0x55   :  { %653 = vmatpush3.msra.mxu0 %v140_v22  ;;  %705 = vmatpush3.msra.mxu1 %v471_v43 }
  0x56   :  { %654 = vmatprep.subr.mxu0 %v155_v23  ;;  %706 = vmatprep.subr.mxu1 %v836_v14 }
  0x57   :  { %655 = vmatpush3.msra.mxu0 %v139_v24  ;;  %707 = vmatpush3.msra.mxu1 %v470_v44 }
  0x58   :  { %656 = vmatprep.subr.mxu0 %v154_v25  ;;  %708 = vmatprep.subr.mxu1 %v836_v14 }
  0x59   :  { %657 = vmatpush3.msra.mxu0 %v138_v26  ;;  %709 = vmatpush3.msra.mxu1 %v469_v45 }
  0x5a   :  { %658 = vmatprep.subr.mxu0 %v153_v27  ;;  %710 = vmatprep.subr.mxu1 %v836_v14 }
  0x5b   :  { %659 = vmatpush3.msra.mxu0 %v137_v28  ;;  %711 = vmatpush3.msra.mxu1 %v468_v46 }
  0x5c   :  { %660 = vmatprep.subr.mxu0 %v152_v29  ;;  %712 = vmatprep.subr.mxu1 %v836_v14 }
  0x5d   :  { %661 = vmatpush3.msra.mxu0 %v136_v30  ;;  %713 = vmatpush3.msra.mxu1 %v467_v47 }
  0x5e   :  { %662 = vmatprep.subr.mxu0 %v151_v31  ;;  %714 = vmatprep.subr.mxu1 %v836_v14 }
  0x5f   :  { %663 = vmatpush3.msra.mxu0 %v135_v32  ;;  %715 = vmatpush3.msra.mxu1 %v466_v48 }
  0x60   :  { %664 = vmatprep.subr.mxu0 %v150_v33  ;;  %716 = vmatprep.subr.mxu1 %v836_v14 }
  0x61   :  { %665 = vmatpush3.msra.mxu0 %v134_v34  ;;  %717 = vmatpush3.msra.mxu1 %v465_v49 }
  0x62   :  { %666 = vmatprep.subr.mxu0 %v149_v35  ;;  %718 = vmatprep.subr.mxu1 %v836_v14 }
  0x63   :  { %667 = vmatpush3.msra.mxu0 %v133_v36  ;;  %719 = vmatpush3.msra.mxu1 %v464_v50 }
  0x64   :  { %668 = vmatprep.subr.mxu0 %v148_v37  ;;  %720 = vmatprep.subr.mxu1 %v836_v14 }
  0x65   :  { %669 = vmatpush3.msra.mxu0 %v132_v38  ;;  %721 = vmatpush3.msra.mxu1 %v463_v51 }
  0x66   :  { %670 = vmatprep.subr.mxu0 %v147_v39  ;;  %722 = vmatprep.subr.mxu1 %v836_v14 }
  0x67   :  { %671 = vmatpush3.msra.mxu0 %v131_v40  ;;  %723 = vmatpush3.msra.mxu1 %v462_v52 }
  0x68   :  { %381 = vmatmul.mubr.f32.vlgmr.msra.gmra.mxu0 %v64_v41  ;;  %724 = vmatprep.subr.mxu1 %v836_v14 }
  0x69   :  { %725 = vmatpush3.msra.mxu1 %v461_v53 }
  0x6a   :  { %726 = vmatprep.subr.mxu1 %v836_v14 }
  0x6b   :  { %727 = vmatpush3.msra.mxu1 %v460_v54 }
  0x6c   :  { %728 = vmatprep.subr.mxu1 %v836_v14 }
  0x6d   :  { %729 = vmatpush3.msra.mxu1 %v459_v55 }
  0x6e   :  { %730 = vmatprep.subr.mxu1 %v836_v14 }
  0x6f   :  { %731 = vmatpush3.msra.mxu1 %v458_v56 }
  0x70   :  { %732 = vmatprep.subr.mxu1 %v836_v14 }
  0x71   :  { %733 = vmatpush3.msra.mxu1 %v457_v57 }
 0x106   :  { %v602_v62 = vpop.f32.mrf.mxu0 }
 0x108   :  { %v603_v63 = vpop.f32.mrf.mxu0 }
 0x109   :  { %v637_v58 = vpop.f32.mrf.mxu1  ;;  %v604_v0 = vadd.f32 %v603_v63, %v602_v62 }
 0x10b   :  { %v638_v59 = vpop.f32.mrf.mxu1  ;;  %v243_v2 = vadd.f32 %v604_v0, %v567_v1 }
 0x10c   :  { %v639_v3 = vadd.f32 %v638_v59, %v637_v58 }
 0x10e   :  { %v313_v6 = vadd.f32 %v639_v3, %v243_v2 }
 0x110   :  { %v452_v60 = vpop.f32.mrf.mxu1 }
 0x112   :  { %v701_v61 = vpop.f32.mrf.mxu1 }
 0x128   :  { %v672_v4 = vpop.f32.mrf.mxu0 }
 0x12a   :  { %v673_v5 = vpop.f32.mrf.mxu0 }
 0x12b   :  { %v674_v7 = vadd.f32 %v673_v5, %v672_v4 }
 0x12d   :  { %v383_v8 = vadd.f32 %v674_v7, %v313_v6 }
 0x12f   :  { %v453_v9 = vadd.f32 %v452_v60, %v383_v8 }
 0x131   :  { %v456_v10 = vmax.f32 %v453_v9, 0.0 }
 0x133   :  { %735 = vmatmul.mubr.f32.vlgmr.msra.gmra.mxu1 %v456_v10 }
 0x1f3   :  { %v546_v12 = vpop.f32.mrf.mxu1 }
 0x1f4   :  { %v547_v13 = vadd.f32 %v569_v11, %v546_v12 }
 0x1f5   :  { %v736_v14 = vpop.f32.mrf.mxu1 }
 0x1f6   :  { %550 = vst [vmem:[#allocation8] sm:$0xff] %v547_v13 }
 0x1f7   :  { %816 = shalt.err (!%p813_p5)
}
 0x1f8   :  { %560 = dma.vmem_to_hbm [thread:$0]  %s558_s12, 128, %s912_s5, [#allocation4]  }
 0x1f9   :  { %829 = dma.done.wait [#allocation4], 128  }
 0x1fa   :  { %830 = vsyncadd [#allocation4], 4294967168 }
 0x1fb   :  { %564 = vsyncpa [#allocation3], 1 }
 0x1fc   :  { %565 = vsyncpa [#allocation6], 1 }
 0x1fd   :  { %566 = vsyncpa [#allocation4], 1 }

</bundles_post_ra>
